<compile_context>
chip_gen: v7x
topology: tpu7x:2x2x1
jax: 0.10.0
libtpu: 0.0.40
codegen_flags: <defaults>
</compile_context>

<pallas_src>
import jax
import jax.numpy as jnp
from jax.experimental import pallas as pl
from jax.experimental.pallas import tpu as pltpu


def _linear_kernel(x_ref, w_ref, b_ref, o_ref):
    # x_ref: (TM, c_s)  w_ref: (c_s, c_out)  b_ref: (1, c_out)  o_ref: (TM, c_out)
    acc = jnp.dot(x_ref[...], w_ref[...], preferred_element_type=jnp.float32)
    acc = acc + b_ref[...].astype(jnp.float32)       # broadcast bias over rows
    o_ref[...] = acc.astype(o_ref.dtype)


def _round_up(x, m):
    return ((x + m - 1) // m) * m


def binding_site_predictor(
    s, weight, bias, *,
    target_tile_bytes=4 * 1024 * 1024,      # ~2-6 MiB of real x traffic per tile
    vmem_tile_budget=36 * 1024 * 1024,      # double-buffered x+out tiles, v7x-safe
):
    """s: (batch, seq, c_s); weight: (c_out, c_s); bias: (c_out,)."""
    batch, seq, c_s = s.shape
    c_out = weight.shape[0]
    M = batch * seq

    x2d = s.reshape(M, c_s)                           # glue: flatten leading dims
    w_t = weight.T.astype(s.dtype)                    # (c_s, c_out), VMEM-resident
    b2d = bias.reshape(1, c_out).astype(s.dtype)

    x_itemsize = jnp.dtype(x2d.dtype).itemsize
    o_itemsize = jnp.dtype(s.dtype).itemsize

    # Sublane alignment of the row axis for this dtype.
    row_align = {4: 8, 2: 16, 1: 32}.get(x_itemsize, 8)

    # --- TM sizing by bytes. ---
    # HBM traffic per x tile uses the real c_s; VMEM footprint uses lane-padded
    # widths (both c_s and c_out pad up to multiples of 128 lanes in VMEM).
    cs_lanes = _round_up(c_s, 128)
    cout_lanes = _round_up(c_out, 128)
    per_row_vmem = 2 * (cs_lanes * x_itemsize + cout_lanes * o_itemsize)  # 2x = double buffer
    tm_vmem_cap = max(row_align, vmem_tile_budget // per_row_vmem)
    tm_target = max(row_align, target_tile_bytes // max(1, c_s * x_itemsize))
    tm = min(tm_vmem_cap, tm_target)
    tm = max(row_align, (tm // row_align) * row_align)

    if tm >= M:
        # Whole slab fits in one tile.  Still split in two when there is enough
        # work to keep both v7x TensorCores busy (M-tiles are "parallel").
        if M * c_s * x_itemsize >= (1 << 20) and M >= 2 * row_align:
            tm = _round_up(pl.cdiv(M, 2), row_align)
        else:
            tm = _round_up(M, row_align)
    else:
        num_tiles = pl.cdiv(M, tm)
        if num_tiles > 1 and num_tiles % 2 == 1:
            # Rebalance to an even tile count so neither core idles on the tail.
            tm = max(row_align, _round_up(pl.cdiv(M, num_tiles + 1), row_align))
    num_tiles = pl.cdiv(M, tm)

    # True (unpadded) traffic / flops so XLA ranks the op correctly.
    cost = pl.CostEstimate(
        flops=2 * M * c_s * c_out,
        transcendentals=0,
        bytes_accessed=(M * c_s * x_itemsize
                        + M * c_out * o_itemsize
                        + c_s * c_out * jnp.dtype(w_t.dtype).itemsize
                        + c_out * jnp.dtype(b2d.dtype).itemsize),
    )

    # VMEM budget: double-buffered x + out tiles (lane-padded) + resident
    # weight/bias (counted double-buffered too — they are tiny) + headroom.
    resident_bytes = 2 * (cs_lanes * cout_lanes * x_itemsize
                          + 8 * 128 * jnp.dtype(b2d.dtype).itemsize)
    needed_bytes = tm * per_row_vmem + resident_bytes
    vmem_limit = int(min(48 * 1024 * 1024,
                         max(32 * 1024 * 1024, needed_bytes + (4 << 20))))

    out2d = pl.pallas_call(
        _linear_kernel,
        out_shape=jax.ShapeDtypeStruct((M, c_out), s.dtype),
        grid_spec=pltpu.PrefetchScalarGridSpec(
            num_scalar_prefetch=0,
            grid=(num_tiles,),
            in_specs=[
                pl.BlockSpec((tm, c_s), lambda i: (i, 0)),      # streamed x tiles
                pl.BlockSpec((c_s, c_out), lambda i: (0, 0)),   # weight resident
                pl.BlockSpec((1, c_out), lambda i: (0, 0)),     # bias resident
            ],
            out_specs=pl.BlockSpec((tm, c_out), lambda i: (i, 0)),
        ),
        compiler_params=pltpu.CompilerParams(
            dimension_semantics=("parallel",),     # M-tiles independent (v7x 2-TC)
            vmem_limit_bytes=vmem_limit,
        ),
        cost_estimate=cost,
    )(x2d, w_t, b2d)

    return out2d.reshape(batch, seq, c_out)


if __name__ == "__main__":
    # Small shapes consistent with the module: s is [batch, N_res, c_s].
    batch, seq, c_s, c_out = 2, 8, 32, 4

    key = jax.random.PRNGKey(0)
    k_s, k_w, k_b = jax.random.split(key, 3)

    s = jax.random.normal(k_s, (batch, seq, c_s), dtype=jnp.float32)
    # Linear(c_s, c_out, init='final') would be zero-init; use small random
    # values so the matmul path is actually exercised.
    weight = 0.02 * jax.random.normal(k_w, (c_out, c_s), dtype=jnp.float32)
    bias = 0.01 * jax.random.normal(k_b, (c_out,), dtype=jnp.float32)

    out = binding_site_predictor(s, weight, bias)
    out = jax.block_until_ready(out)

    # Reference check against plain JAX (same math as torch.nn.Linear).
    ref = s @ weight.T + bias
    assert out.shape == (batch, seq, c_out)
    assert jnp.allclose(out, ref, atol=1e-5, rtol=1e-5)

    print("KERNEL_OK")
</pallas_src>

<mosaic_0001>
module attributes {stable_mosaic.version = 11 : i64} {
  func.func @_linear_kernel(%arg0: i32, %arg1: memref<16x32xf32, #tpu.memory_space<vmem>>, %arg2: memref<32x4xf32, #tpu.memory_space<vmem>>, %arg3: memref<1x4xf32, #tpu.memory_space<vmem>>, %arg4: memref<16x4xf32, #tpu.memory_space<vmem>>) attributes {dimension_semantics = [#tpu.dimension_semantics<parallel>], iteration_bounds = array<i64: 1>, scalar_prefetch = 0 : i64, scratch_operands = 0 : i64, tpu.core_type = #tpu.core_type<tc>, window_params = [{transform_indices = @transform_0, window_bounds = array<i64: 16, 32>}, {pipeline_mode = #tpu.pipeline_mode<synchronous>, transform_indices = @transform_1, window_bounds = array<i64: 32, 4>}, {pipeline_mode = #tpu.pipeline_mode<synchronous>, transform_indices = @transform_2, window_bounds = array<i64: 1, 4>}, {transform_indices = @transform_3, window_bounds = array<i64: 16, 4>}]} {
    %c0 = arith.constant 0 : index
    %c0_0 = arith.constant 0 : index
    %0 = vector.load %arg1[%c0, %c0_0] : memref<16x32xf32, #tpu.memory_space<vmem>>, vector<16x32xf32>
    %c0_1 = arith.constant 0 : index
    %c0_2 = arith.constant 0 : index
    %1 = vector.load %arg2[%c0_1, %c0_2] : memref<32x4xf32, #tpu.memory_space<vmem>>, vector<32x4xf32>
    %cst = arith.constant dense<0.000000e+00> : vector<16x4xf32>
    %2 = tpu.matmul %0, %1, %cst {dimension_numbers = #tpu.dot_dimension_numbers<[1], [0], [0], [1], [0, 0, 1, 1], [], []>} : vector<16x32xf32>, vector<32x4xf32>, vector<16x4xf32> -> vector<16x4xf32>
    %c0_3 = arith.constant 0 : index
    %c0_4 = arith.constant 0 : index
    %3 = vector.load %arg3[%c0_3, %c0_4] : memref<1x4xf32, #tpu.memory_space<vmem>>, vector<1x4xf32>
    %4 = vector.broadcast %3 : vector<1x4xf32> to vector<16x4xf32>
    %5 = arith.addf %2, %4 : vector<16x4xf32>
    %c0_5 = arith.constant 0 : index
    %c0_6 = arith.constant 0 : index
    %6 = vector.load %arg4[%c0_5, %c0_6] : memref<16x4xf32, #tpu.memory_space<vmem>>, vector<16x4xf32>
    tpu.vector_store %arg4[%c0_5, %c0_6], %5 {strides = array<i32>} : memref<16x4xf32, #tpu.memory_space<vmem>>, vector<16x4xf32>,
    return
  }
  func.func @transform_0(%arg0: i32) -> (i32, i32) {
    %c0_i32 = arith.constant 0 : i32
    %c0_i32_0 = arith.constant 0 : i32
    return %arg0, %c0_i32 : i32, i32
  }
  func.func @transform_1(%arg0: i32) -> (i32, i32) {
    %c0_i32 = arith.constant 0 : i32
    %c0_i32_0 = arith.constant 0 : i32
    %c0_i32_1 = arith.constant 0 : i32
    return %c0_i32, %c0_i32_0 : i32, i32
  }
  func.func @transform_2(%arg0: i32) -> (i32, i32) {
    %c0_i32 = arith.constant 0 : i32
    %c0_i32_0 = arith.constant 0 : i32
    %c0_i32_1 = arith.constant 0 : i32
    return %c0_i32, %c0_i32_0 : i32, i32
  }
  func.func @transform_3(%arg0: i32) -> (i32, i32) {
    %c0_i32 = arith.constant 0 : i32
    %c0_i32_0 = arith.constant 0 : i32
    return %arg0, %c0_i32 : i32, i32
  }
}

</mosaic_0001>

<bundles_post_ra>
// kernel: tpu_custom_call.1
= control target key start
LH: loop header
LB: loop body
LE: loop exit
PB: predicated region body
PF: predicated region fallthrough
CT: control target
= control target key end

     0   :  { %vm27_vm0 = vcmask 261120   ;;  %vm109_vm1 = vcmask 31744   ;;  %s191_s1 = inlined_call_operand.vmem [shape: f32[32,4], index: 1, kind: input, shape index: {}]   ;;  %s192_s0 = inlined_call_operand.vmem [shape: f32[16,32], index: 0, kind: input, shape index: {}]   ;;  %s193_s2 = inlined_call_operand.vmem [shape: f32[1,4], index: 2, kind: input, shape index: {}]   ;;  %s194_s3 = inlined_call_operand.vmem [shape: f32[16,4], index: 3, kind: output, shape index: {}]  }
   0x1   :  { %v16_v0 = vld [vmem:[%s191_s1] sm:$0xff]  ;;  %v17_v1 = vld [vmem:[%s191_s1 + $0x8] sm:$0xff]  ;;  %v18_v2 = vld [vmem:[%s191_s1 + $0x10] sm:$0xff] }
   0x2   :  { %v136_v3 = vpack.c.bf16 %v17_v1, %v16_v0  ;;  %v19_v4 = vld [vmem:[%s191_s1 + $0x18] sm:$0xff]  ;;  %v14_v5 = vld [vmem:[%s192_s0] sm:$0xff]  ;;  %v15_v7 = vld [vmem:[%s192_s0 + $0x8] sm:$0xff] }
   0x3   :  { %v140_v6 = vpack.c.bf16 %v19_v4, %v18_v2  ;;  %133 = vmatprep.mubr.msk.f32.mxu0 %vm27_vm0, %v14_v5  ;;  %v116_v8 = vld [vmem:[%s193_s2] ss:$0 sm:$0xff] }
   0x4   :  { %137 = vmatprep.subr.bf16.mxu0 %v136_v3 }
   0x5   :  { %139 = vmatpush3.bf16.msra.mxu0 %v136_v3 }
   0x6   :  { %141 = vmatprep.subr.bf16.mxu0 %v140_v6 }
   0x9   :  { %143 = vmatpush3.bf16.msra.mxu0 %v140_v6 }
   0xc   :  { %134 = vmatmul.mubr.msk.f32.vlgmr.msra.gmra.mrb[0].mxu0 %vm27_vm0, %v15_v7 }
  0xdf   :  { %v135_v9 = vpop.f32.mrb[0].mxu0 }
  0xe0   :  { %v106_v10 = vadd.f32 %v135_v9, %v116_v8  ;;  %v100_v11 = vpop.f32.mrb[1].mxu0 }
  0xe1   :  { %v101_v12 = vadd.f32 %v116_v8, %v100_v11 }
  0xe2   :  { %111 = vst.msk [vmem:[%s194_s3 + $0x8] sm:$0xff] %vm109_vm1, %v106_v10 }
  0xe3   :  { %110 = vst.msk [vmem:[%s194_s3] sm:$0xff] %vm109_vm1, %v101_v12 }

</bundles_post_ra>
